<compile_context>
chip_gen: v6e
topology: v6e:2x2x1
jax: 0.10.0
libtpu: 0.0.40
codegen_flags: <defaults>
</compile_context>

<pallas_src>
import functools

import jax
import jax.numpy as jnp
from jax.experimental import pallas as pl
from jax.experimental.pallas import tpu as pltpu


_NEG_INF = -1e30  # finite "-inf" for masking / running-max init (avoids inf-inf NaNs)


# ---------------------------------------------------------------------------
# helpers
# ---------------------------------------------------------------------------
def _pick_tile(dim_size, targets):
    """First target that evenly divides the axis, else the full axis."""
    for t in targets:
        if dim_size % t == 0:
            return t
    return dim_size


_COMPILER_PARAMS_MM = pltpu.CompilerParams(
    dimension_semantics=("parallel", "parallel", "arbitrary"),
    vmem_limit_bytes=32 * 1024 * 1024,
)


# ---------------------------------------------------------------------------
# Tiled projection matmul (K-reduction grid + f32 accumulator, bf16 MXU feed)
# ---------------------------------------------------------------------------
def _mm_kernel(x_ref, w_ref, o_ref, acc_ref):
    @pl.when(pl.program_id(2) == 0)
    def _init():
        acc_ref[...] = jnp.zeros_like(acc_ref)

    acc_ref[...] += jnp.dot(
        x_ref[...], w_ref[...], preferred_element_type=jnp.float32
    )

    @pl.when(pl.program_id(2) == pl.num_programs(2) - 1)
    def _done():
        o_ref[...] = acc_ref[...].astype(o_ref.dtype)


def _mm_bias_kernel(x_ref, w_ref, b_ref, o_ref, acc_ref):
    @pl.when(pl.program_id(2) == 0)
    def _init():
        acc_ref[...] = jnp.zeros_like(acc_ref)

    acc_ref[...] += jnp.dot(
        x_ref[...], w_ref[...], preferred_element_type=jnp.float32
    )

    @pl.when(pl.program_id(2) == pl.num_programs(2) - 1)
    def _done():
        o_ref[...] = (acc_ref[...] + b_ref[...]).astype(o_ref.dtype)


def pallas_matmul(x, w, b=None, *, out_dtype=None,
                  tm_targets=(512, 256, 128),
                  tn_targets=(512, 256, 128),
                  tk_targets=(1024, 512, 256, 128)):
    """x: (M, K), w: (K, N) (pre-transposed), optional f32 bias b: (N,)."""
    M, K = x.shape
    K2, N = w.shape
    assert K == K2
    out_dtype = out_dtype or x.dtype

    tm = _pick_tile(M, tm_targets)
    tn = _pick_tile(N, tn_targets)
    tk = _pick_tile(K, tk_targets)
    grid = (M // tm, N // tn, K // tk)

    x_spec = pl.BlockSpec((tm, tk), lambda i, j, k: (i, k))
    w_spec = pl.BlockSpec((tk, tn), lambda i, j, k: (k, j))
    o_spec = pl.BlockSpec((tm, tn), lambda i, j, k: (i, j))
    scratch = [pltpu.VMEM((tm, tn), jnp.float32)]
    out_shape = jax.ShapeDtypeStruct((M, N), out_dtype)

    if b is None:
        return pl.pallas_call(
            _mm_kernel,
            out_shape=out_shape,
            grid_spec=pltpu.PrefetchScalarGridSpec(
                num_scalar_prefetch=0,
                grid=grid,
                in_specs=[x_spec, w_spec],
                out_specs=o_spec,
                scratch_shapes=scratch,
            ),
            compiler_params=_COMPILER_PARAMS_MM,
        )(x, w)

    b2 = b.reshape(1, N).astype(jnp.float32)
    b_spec = pl.BlockSpec((1, tn), lambda i, j, k: (0, j))
    return pl.pallas_call(
        _mm_bias_kernel,
        out_shape=out_shape,
        grid_spec=pltpu.PrefetchScalarGridSpec(
            num_scalar_prefetch=0,
            grid=grid,
            in_specs=[x_spec, w_spec, b_spec],
            out_specs=o_spec,
            scratch_shapes=scratch,
        ),
        compiler_params=_COMPILER_PARAMS_MM,
    )(x, w, b2)


# ---------------------------------------------------------------------------
# Flash-style attention core (online softmax, 2 heads / lane-dense 128 blocks)
# ---------------------------------------------------------------------------
def _flash_attn_kernel(q_ref, k_ref, v_ref, o_ref, m_sc, l_sc, acc_sc,
                       *, dim_head, tk, seq_len, n_pad):
    ki = pl.program_id(2)

    @pl.when(ki == 0)
    def _init():
        m_sc[...] = jnp.full_like(m_sc, _NEG_INF)
        l_sc[...] = jnp.zeros_like(l_sc)
        acc_sc[...] = jnp.zeros_like(acc_sc)

    q = q_ref[0]  # (tq, 2*dim_head) bf16 -- softmax scale already folded in
    k = k_ref[0]  # (tk, 2*dim_head) bf16
    v = v_ref[0]  # (tk, 2*dim_head) bf16

    # KV padding mask (static: only emitted when the sequence was padded).
    if seq_len != n_pad:
        kv_idx = ki * tk + jax.lax.broadcasted_iota(jnp.int32, (1, tk), 1)
        kv_valid = kv_idx < seq_len
    else:
        kv_valid = None

    # Two heads per grid step; each head's slice lives in half of the 128 lanes.
    # TODO(synk): if the bundle dump shows per-step XLU relayouts from the
    # 64-lane offset slices, stage the halves in vreg-aligned scratch instead.
    for h in range(2):
        lo = h * dim_head
        qh = q[:, lo:lo + dim_head]
        kh = k[:, lo:lo + dim_head]
        vh = v[:, lo:lo + dim_head]

        # Contract last dims directly (no in-kernel transpose of K); bf16 MXU.
        s = jax.lax.dot_general(
            qh, kh, (((1,), (1,)), ((), ())),
            preferred_element_type=jnp.float32,
        )  # (tq, tk) f32
        if kv_valid is not None:
            s = jnp.where(kv_valid, s, _NEG_INF)

        m_prev = m_sc[h]                                       # (tq, 1)
        m_new = jnp.maximum(m_prev, jnp.max(s, axis=-1, keepdims=True))
        alpha = jnp.exp(m_prev - m_new)
        p = jnp.exp(s - m_new)                                 # (tq, tk) f32
        l_sc[h] = alpha * l_sc[h] + jnp.sum(p, axis=-1, keepdims=True)
        acc_sc[h] = alpha * acc_sc[h] + jnp.dot(
            p.astype(vh.dtype), vh, preferred_element_type=jnp.float32
        )
        m_sc[h] = m_new

    @pl.when(ki == pl.num_programs(2) - 1)
    def _done():
        out0 = acc_sc[0] * pl.reciprocal(l_sc[0], approx=True)
        out1 = acc_sc[1] * pl.reciprocal(l_sc[1], approx=True)
        # Single lane-dense 128-wide store.
        o_ref[0] = jnp.concatenate([out0, out1], axis=-1).astype(o_ref.dtype)


def pallas_flash_attention(qkv, heads, dim_head, seq_len, *, tq=256, tk=512):
    """qkv: (B, N_pad, 3*heads*dim_head) fused projection -> (B, N_pad, heads*dim_head).

    Padded positions (index >= seq_len) are masked out of the softmax.
    """
    B, n_pad, three_inner = qkv.shape
    inner_dim = heads * dim_head
    assert three_inner == 3 * inner_dim
    assert heads % 2 == 0 and (2 * dim_head) % 128 == 0, (
        "head-pair packing requires an even head count and 2*dim_head % 128 == 0"
    )
    hp = heads // 2          # number of head pairs == number of 128-wide blocks
    dpair = 2 * dim_head     # 128 lanes per block
    tq = _pick_tile(n_pad, (tq, 256, 128))
    tk = _pick_tile(n_pad, (tk, 256, 128))
    # Fuse batch and head-pair axes so the leading parallel axis splits evenly
    # across v7x's two TensorCores even when B is 1 or odd.
    grid = (B * hp, n_pad // tq, n_pad // tk)

    # q / k / v are all read out of the same fused qkv tensor; the index_map
    # picks the chunk (q=0, k=1, v=2) and the head pair -> no wrapper splits.
    q_spec = pl.BlockSpec((1, tq, dpair), lambda bh, qi, ki: (bh // hp, qi, bh % hp))
    k_spec = pl.BlockSpec((1, tk, dpair), lambda bh, qi, ki: (bh // hp, ki, hp + bh % hp))
    v_spec = pl.BlockSpec((1, tk, dpair), lambda bh, qi, ki: (bh // hp, ki, 2 * hp + bh % hp))
    o_spec = pl.BlockSpec((1, tq, dpair), lambda bh, qi, ki: (bh // hp, qi, bh % hp))

    return pl.pallas_call(
        functools.partial(_flash_attn_kernel, dim_head=dim_head, tk=tk,
                          seq_len=seq_len, n_pad=n_pad),
        out_shape=jax.ShapeDtypeStruct((B, n_pad, inner_dim), qkv.dtype),
        grid_spec=pltpu.PrefetchScalarGridSpec(
            num_scalar_prefetch=0,
            grid=grid,
            in_specs=[q_spec, k_spec, v_spec],
            out_specs=o_spec,
            scratch_shapes=[
                pltpu.VMEM((2, tq, 1), jnp.float32),         # running max
                pltpu.VMEM((2, tq, 1), jnp.float32),         # running denom
                pltpu.VMEM((2, tq, dim_head), jnp.float32),  # output accumulator
            ],
        ),
        compiler_params=pltpu.CompilerParams(
            dimension_semantics=("parallel", "parallel", "arbitrary"),
            vmem_limit_bytes=32 * 1024 * 1024,
        ),
    )(qkv, qkv, qkv)


# ---------------------------------------------------------------------------
# Attention module (forward only; Dropout(0.0) == identity)
# ---------------------------------------------------------------------------
def init_attention_params(key, dim, heads=8, dim_head=64):
    inner_dim = dim_head * heads
    k1, k2, k3 = jax.random.split(key, 3)
    # Weights stored pre-transposed as (in_features, out_features) so the
    # forward never has to transpose them (PyTorch's nn.Linear stores
    # (out, in); transpose once when importing a checkpoint).
    w_qkv = jax.random.normal(k1, (dim, inner_dim * 3), jnp.float32) * 0.02
    w_out = jax.random.normal(k2, (inner_dim, dim), jnp.float32) * 0.02
    b_out = jax.random.normal(k3, (dim,), jnp.float32) * 0.02
    return {"w_qkv": w_qkv, "w_out": w_out, "b_out": b_out}


def prepare_attention_params(params, heads=8, dim_head=64,
                             compute_dtype=jnp.bfloat16):
    """One-time parameter prep: fold the softmax scale into the q-columns of
    W_qkv (exactly free at import time) and cast weights to the bf16 MXU dtype.
    The output-projection bias stays f32 (added in the f32 accumulator)."""
    inner_dim = heads * dim_head
    scale = dim_head ** (-0.5)
    w_qkv = params["w_qkv"].at[:, :inner_dim].multiply(scale)
    return {
        "w_qkv": w_qkv.astype(compute_dtype),
        "w_out": params["w_out"].astype(compute_dtype),
        "b_out": params["b_out"].astype(jnp.float32),
    }


def attention_forward(params, x, heads=8, dim_head=64):
    """params must come from prepare_attention_params (bf16, scale folded)."""
    B, N, dim = x.shape
    inner_dim = dim_head * heads
    compute_dtype = params["w_qkv"].dtype

    # Pad the sequence axis to a multiple of 128 so every block stays
    # (8,128)-aligned; padded KV positions are masked in the flash kernel and
    # padded rows are sliced off at the end.
    n_pad = pl.cdiv(N, 128) * 128
    if n_pad != N:
        x = jnp.pad(x, ((0, 0), (0, n_pad - N), (0, 0)))

    # to_qkv: (B*n_pad, dim) @ (dim, 3*inner_dim), no bias, bf16 MXU feed.
    x2d = x.reshape(B * n_pad, dim).astype(compute_dtype)
    qkv = pallas_matmul(x2d, params["w_qkv"])            # (B*n_pad, 3*inner_dim)
    qkv = qkv.reshape(B, n_pad, 3 * inner_dim)

    # Fused flash attention; head split/merge handled by BlockSpec index_maps,
    # output comes back already in (B, n_pad, inner_dim) layout.
    out = pallas_flash_attention(qkv, heads, dim_head, seq_len=N)

    # to_out: Linear(inner_dim, dim) with bias; Dropout(0.0) is identity.
    y = pallas_matmul(out.reshape(B * n_pad, inner_dim), params["w_out"],
                      params["b_out"], out_dtype=jnp.float32)
    y = y.reshape(B, n_pad, dim)
    return y[:, :N, :]


# ---------------------------------------------------------------------------
# Pure-JAX reference for correctness check (f32 everywhere)
# ---------------------------------------------------------------------------
def attention_reference(params, x, heads=8, dim_head=64):
    B, N, dim = x.shape
    inner_dim = dim_head * heads
    scale = dim_head ** (-0.5)
    qkv = x @ params["w_qkv"]
    q, k, v = jnp.split(qkv, 3, axis=-1)
    rs = lambda t: t.reshape(B, N, heads, dim_head).transpose(0, 2, 1, 3)
    q, k, v = map(rs, (q, k, v))
    dots = jnp.einsum("bhnd,bhmd->bhnm", q, k) * scale
    attn = jax.nn.softmax(dots, axis=-1)
    out = jnp.einsum("bhnm,bhmd->bhnd", attn, v)
    out = out.transpose(0, 2, 1, 3).reshape(B, N, inner_dim)
    return out @ params["w_out"] + params["b_out"]


if __name__ == "__main__":
    B, N, dim = 2, 8, 32
    heads, dim_head = 8, 64

    key = jax.random.PRNGKey(0)
    kp, kx = jax.random.split(key)
    params = init_attention_params(kp, dim, heads, dim_head)
    x = jax.random.normal(kx, (B, N, dim), jnp.float32)

    prepared = prepare_attention_params(params, heads, dim_head)
    y = attention_forward(prepared, x, heads, dim_head)
    y = jax.block_until_ready(y)

    y_ref = attention_reference(params, x, heads, dim_head)
    assert y.shape == (B, N, dim)
    # bf16 compute path vs f32 reference -> loosened tolerance.
    max_err = float(jnp.max(jnp.abs(y - y_ref)))
    assert jnp.allclose(y, y_ref, atol=3e-2, rtol=3e-2), (
        f"mismatch vs reference (max abs err {max_err})")

    print("KERNEL_OK")
</pallas_src>

<mosaic_0001>
module attributes {stable_mosaic.version = 11 : i64} {
  func.func @_mm_kernel(%arg0: i32, %arg1: i32, %arg2: i32, %arg3: memref<256x32xbf16, #tpu.memory_space<vmem>>, %arg4: memref<32x512xbf16, #tpu.memory_space<vmem>>, %arg5: memref<256x512xbf16, #tpu.memory_space<vmem>>, %arg6: memref<256x512xf32, #tpu.memory_space<vmem>>) attributes {dimension_semantics = [#tpu.dimension_semantics<parallel>, #tpu.dimension_semantics<parallel>, #tpu.dimension_semantics<arbitrary>], iteration_bounds = array<i64: 1, 3, 1>, scalar_prefetch = 0 : i64, scratch_operands = 1 : i64, tpu.core_type = #tpu.core_type<tc>, window_params = [{transform_indices = @transform_0, window_bounds = array<i64: 256, 32>}, {transform_indices = @transform_1, window_bounds = array<i64: 32, 512>}, {transform_indices = @transform_2, window_bounds = array<i64: 256, 512>}]} {
    %c0_i32 = arith.constant 0 : i32
    %0 = arith.cmpi eq, %arg2, %c0_i32 : i32
    %1 = arith.extui %0 : i1 to i32
    %c0_i32_0 = arith.constant 0 : i32
    %2 = arith.cmpi ne, %1, %c0_i32_0 : i32
    scf.if %2 {
      %cst_10 = arith.constant 0.000000e+00 : f32
      %12 = vector.broadcast %cst_10 : f32 to vector<256x512xf32>
      %c0_11 = arith.constant 0 : index
      %c0_12 = arith.constant 0 : index
      %13 = vector.load %arg6[%c0_11, %c0_12] : memref<256x512xf32, #tpu.memory_space<vmem>>, vector<256x512xf32>
      tpu.vector_store %arg6[%c0_11, %c0_12], %12 {strides = array<i32>} : memref<256x512xf32, #tpu.memory_space<vmem>>, vector<256x512xf32>,
    } else {
    }
    %c0 = arith.constant 0 : index
    %c0_1 = arith.constant 0 : index
    %3 = vector.load %arg6[%c0, %c0_1] : memref<256x512xf32, #tpu.memory_space<vmem>>, vector<256x512xf32>
    %c0_2 = arith.constant 0 : index
    %c0_3 = arith.constant 0 : index
    %4 = vector.load %arg3[%c0_2, %c0_3] : memref<256x32xbf16, #tpu.memory_space<vmem>>, vector<256x32xbf16>
    %c0_4 = arith.constant 0 : index
    %c0_5 = arith.constant 0 : index
    %5 = vector.load %arg4[%c0_4, %c0_5] : memref<32x512xbf16, #tpu.memory_space<vmem>>, vector<32x512xbf16>
    %cst = arith.constant dense<0.000000e+00> : vector<256x512xf32>
    %6 = tpu.matmul %4, %5, %cst {dimension_numbers = #tpu.dot_dimension_numbers<[1], [0], [0], [1], [0, 0, 1, 1], [], []>} : vector<256x32xbf16>, vector<32x512xbf16>, vector<256x512xf32> -> vector<256x512xf32>
    %7 = arith.addf %3, %6 : vector<256x512xf32>
    %c0_6 = arith.constant 0 : index
    %c0_7 = arith.constant 0 : index
    %8 = vector.load %arg6[%c0_6, %c0_7] : memref<256x512xf32, #tpu.memory_space<vmem>>, vector<256x512xf32>
    tpu.vector_store %arg6[%c0_6, %c0_7], %7 {strides = array<i32>} : memref<256x512xf32, #tpu.memory_space<vmem>>, vector<256x512xf32>,
    %c0_i32_8 = arith.constant 0 : i32
    %9 = arith.cmpi eq, %arg2, %c0_i32_8 : i32
    %10 = arith.extui %9 : i1 to i32
    %c0_i32_9 = arith.constant 0 : i32
    %11 = arith.cmpi ne, %10, %c0_i32_9 : i32
    scf.if %11 {
      %c0_10 = arith.constant 0 : index
      %c0_11 = arith.constant 0 : index
      %12 = vector.load %arg6[%c0_10, %c0_11] : memref<256x512xf32, #tpu.memory_space<vmem>>, vector<256x512xf32>
      %13 = arith.truncf %12 : vector<256x512xf32> to vector<256x512xbf16>
      %c0_12 = arith.constant 0 : index
      %c0_13 = arith.constant 0 : index
      %14 = vector.load %arg5[%c0_12, %c0_13] : memref<256x512xbf16, #tpu.memory_space<vmem>>, vector<256x512xbf16>
      tpu.vector_store %arg5[%c0_12, %c0_13], %13 {strides = array<i32>} : memref<256x512xbf16, #tpu.memory_space<vmem>>, vector<256x512xbf16>,
    } else {
    }
    return
  }
  func.func @transform_0(%arg0: i32, %arg1: i32, %arg2: i32) -> (i32, i32) {
    %c0_i32 = arith.constant 0 : i32
    return %arg0, %arg2 : i32, i32
  }
  func.func @transform_1(%arg0: i32, %arg1: i32, %arg2: i32) -> (i32, i32) {
    %c0_i32 = arith.constant 0 : i32
    return %arg2, %arg1 : i32, i32
  }
  func.func @transform_2(%arg0: i32, %arg1: i32, %arg2: i32) -> (i32, i32) {
    %c0_i32 = arith.constant 0 : i32
    return %arg0, %arg1 : i32, i32
  }
}

</mosaic_0001>

<bundles_post_ra>
// kernel: tpu_custom_call.1
= control target key start
LH: loop header
LB: loop body
LE: loop exit
PB: predicated region body
PF: predicated region fallthrough
CT: control target
= control target key end

     0   :  { %7 = vsyncpa [#allocation4], 0  ;;  %s2796_s0 = inlined_call_operand.vmem [shape: bf16[256,32], index: 0, kind: input, shape index: {}]   ;;  %s2797_s1 = inlined_call_operand.hbm [shape: bf16[32,1536], index: 1, kind: input, shape index: {}]   ;;  %s2798_s2 = inlined_call_operand.hbm [shape: bf16[256,1536], index: 2, kind: output, shape index: {}]  }
   0x1   :  { %9 = vsyncpa [#allocation4 + $0x1], 0 }
   0x2   :  { %10 = vsyncpa [#allocation5], 0 }
   0x3   :  { %12 = vsyncpa [#allocation5 + $0x1], 0  ;;  %s2474_s9 = smov 0   ;;  %s2476_s10 = smov 0  }
   0x4   :  { %s2478_s11 = smov 0   ;;  %s2480_s12 = smov 0  }
   0x5   :  { %s2482_s13 = smov 0   ;;  %s2484_s14 = smov 0  }
   0x6 LB: > { %s2041_s15 = sadd.s32 4294967295, %s2448_s14   ;;  %s2042_s16 = sadd.s32 4294967294, %s2448_s14   ;;  %s2448_s14 = sphi %s2484_s14, %s18_s14   ;;  %s2444_s13 = sphi %s2482_s13, %s2808_s13   ;;  %s2440_s12 = sphi %s2480_s12, %s2807_s12   ;;  %s2436_s11 = sphi %s2478_s11, %s2806_s11   ;;  %s2432_s10 = sphi %s2476_s10, %s2805_s10   ;;  %s2428_s9 = sphi %s2474_s9, %s2804_s9  }
   0x7   : > { %s33_s17 = sadd.s32 1, %s2444_s13  ;;  %s74_s18 = sadd.s32 1, %s2436_s11 }
   0x8   : > { %p35_p0 = scmp.ge.s32.totalorder %s33_s17, 3  ;;  %p81_p1 = scmp.ne.s32.totalorder %s2436_s11, %s2432_s10 }
   0x9   : > { %p82_p2 = scmp.eq.s32.totalorder %s2448_s14, 0  ;;  %p87_p3 = scmp.ne.s32.totalorder %s2432_s10, %s2428_s9 }
   0xa   : > { %s2810_s17 = smov (%p35_p0, %s33_s17), 0  ;;  %p88_p5 = scmp.eq.s32.totalorder %s2041_s15, 0 }
   0xb   : > { %p2515_p4 = por %p82_p2, %p81_p1  ;;  %s70_s20 = ssub.s32 %s2444_s13, %s2810_s17 }
   0xc   : > { %p113_p6 = scmp.eq.s32.totalorder %s2041_s15, 2  ;;  %p72_p7 = scmp.eq.s32.totalorder %s70_s20, 0 }
   0xd   : > { %p2521_p8 = por %p88_p5, %p87_p3  ;;  %p119_p10 = scmp.eq.s32.totalorder %s2042_s16, 2 }
   0xe   : > { %p2525_p9 = por %p113_p6, %p81_p1  ;;  %p2255_p12 = scmp.lt.s32.totalorder %s2448_s14, 3 }
   0xf   : > { %s2530_s23 = scalar_select %p72_p7, %s2436_s11, %s74_s18  }
  0x10   : > { %p2532_p11 = por %p119_p10, %p87_p3  ;;  %s151_s25 = sand.u32 1, %s2436_s11  }
  0x11   : > { %s2046_s26 = sshll.u32 %s151_s25, 6  ;;  %s2177_s27 = sshll.u32 %s2444_s13, 8 }
  0x12   : > { %s164_s30 = scalar_lea.hbm %s2797_s1, %s2177_s27  ;;  %s155_s3 = scalar_lea.vmem [#allocation3], %s2046_s26 }
  0x13   : > { %s165_s4 = sshll.u32 %s155_s3, 4  ;;  %p2544_p13 = pnand %p2255_p12, %p2515_p4  ;;  %s166_s4 = int_to_ptr.vmem [resolvable:$true] %s165_s4 }
  0x14   : > { %s152_s6 = scalar_lea.sflag [#allocation4], %s151_s25  ;;  %s2353_s7 = scalar_lea.vmem %s166_s4, 1024 }
  0x15   : > { %p2342_p0 = pneg %p2544_p13  ;;  %p2354_p1 = scmp.ne.s32.totalorder %s166_s4, %s2353_s7 }
  0x16   : > { %s2450_s8 = smov [#allocation3]  }
  0x17   : > { %p2356_p2 = pnand %p2354_p1, %p2342_p0  ;;  %s2358_s15 = sshll.u32 %s2450_s8, 4  ;;  %s2359_s15 = int_to_ptr.vmem [resolvable:$false] %s2358_s15 }
  0x18   : > { %s2360_s16 = scalar_lea.vmem %s2359_s15, 2048  ;;  %p2361_p5 = scmp.lt.s32.totalorder %s166_s4, %s2359_s15 }
  0x19   : > { %p2357_p3 = pneg %p2356_p2  ;;  %p2362_p6 = scmp.lt.s32.totalorder %s2360_s16, %s2353_s7 }
  0x1b   : > { %p2363_p7 = por %p2362_p6, %p2361_p5 }
  0x1d   : > { %p2364_p10 = pnand %p2363_p7, %p2357_p3 }
  0x1f   : > { %2367 = shalt.err (!%p2364_p10)
}
  0x20   : > { %s2451_s18 = smov 768   ;;  %s2452_s19 = smov 256  }
  0x21   : > { %s2453_s20 = smov 16   ;;  %p2049_p4 = scmp.ge.s32.totalorder %s2448_s14, 1 }
  0x22   : > { %2250 = dma.hbm_to_vmem [thread:$0]  (!%p2544_p13), %s164_s30, 1024, %s166_s4, %s152_s6, %s2451_s18, %s2452_s19, %s2453_s20  }
  0x23   : > { %p173_p12 = scmp.lt.s32.totalorder %s2448_s14, 4 }
  0x25   : > { %p174_p0 = pnand %p2049_p4, %p173_p12 }
  0x26   : > { %s2555_s25 = sand.u32 (!%p174_p0), 1, %s2432_s10  }
  0x27   : > { %177 = sbr.rel (%p174_p0) target bundleno = 391 (0x187), region = 28  ;;  %s2050_s26 = sshll.u32 (!%p174_p0), %s2555_s25, 6 }
  0x28   : > { %s180_s27 = scalar_lea.sflag (!%p174_p0), [#allocation4], %s2555_s25  ;;  %s183_s28 = scalar_lea.vmem (!%p174_p0), [#allocation3], %s2050_s26 }
  0x2c   : > { %2419 = dma.done.wait (%p2521_p8), %s180_s27, 1024  }
  0x2d   : > { %2421 = vsyncadd (%p2521_p8), %s180_s27, 4294966272  ;;  %v2454_v0 = vmov 0   ;;  %v2312_v1 = vld [vmem:[%s183_s28 + $0x24] ss:$16 sps:$4 sm:$0xff]   ;;  %v2314_v2 = vld [vmem:[%s183_s28 + $0x2c] ss:$16 sps:$4 sm:$0xff]  }
  0x2e   : > { %727 = vmatprep.mubr.bf16.mxu0 %v2454_v0  ;;  %920 = vmatprep.mubr.bf16.mxu1 %v2454_v0  ;;  %v2316_v3 = vld [vmem:[%s183_s28 + $0x20] ss:$16 sps:$4 sm:$0xff]   ;;  %v2317_v4 = vld [vmem:[%s183_s28 + $0x28] ss:$16 sps:$4 sm:$0xff]   ;;  %v2318_v5 = vld [vmem:[%s183_s28 + $0x4] ss:$16 sps:$4 sm:$0xff]  }
  0x2f   : > { %707 = vmatprep.subr.bf16.mxu0 %v2312_v1  ;;  %900 = vmatprep.subr.bf16.mxu1 %v2314_v2  ;;  %v2320_v6 = vld [vmem:[%s183_s28 + $0xc] ss:$16 sps:$4 sm:$0xff]   ;;  %v2322_v7 = vld [vmem:[%s183_s28] ss:$16 sps:$4 sm:$0xff]   ;;  %v2323_v8 = vld [vmem:[%s183_s28 + $0x8] ss:$16 sps:$4 sm:$0xff]  }
  0x30   : > { %708 = vmatpush1.bf16.msra.mxu0 %v2316_v3  ;;  %901 = vmatpush1.bf16.msra.mxu1 %v2317_v4  ;;  %v2324_v9 = vld [vmem:[%s2796_s0] sm:$0xff]   ;;  %vm646_vm0 = vcmask 261120   ;;  %v2325_v10 = vld [vmem:[%s2796_s0 + $0x8] sm:$0xff]   ;;  %v2326_v11 = vld [vmem:[%s2796_s0 + $0x10] sm:$0xff]   ;;  %s2051_s27 = sshll.u32 %s2555_s25, 9  ;;  %s2242_s21 = sshll.u32 %s2440_s12, 8 }
  0x31   : > { %709 = vmatprep.subr.bf16.mxu0 %v2318_v5  ;;  %902 = vmatprep.subr.bf16.mxu1 %v2320_v6  ;;  %v2327_v12 = vld [vmem:[%s2796_s0 + $0x18] sm:$0xff]   ;;  %v2328_v13 = vld [vmem:[%s2796_s0 + $0x20] sm:$0xff]   ;;  %v2329_v14 = vld [vmem:[%s2796_s0 + $0x28] sm:$0xff]   ;;  %s2676_s28 = scalar_lea.vmem [#allocation6], %s2051_s27  ;;  %s2745_s4 = scalar_lea.hbm %s2798_s2, %s2242_s21 }
  0x32   : > { %v2330_v15 = vld [vmem:[%s2796_s0 + $0x30] sm:$0xff]   ;;  %v2331_v16 = vld [vmem:[%s2796_s0 + $0x38] sm:$0xff]   ;;  %v2332_v17 = vld [vmem:[%s2796_s0 + $0x40] sm:$0xff]   ;;  %s1933_s29 = sshll.u32 %s2676_s28, 4  ;;  %s1917_s12 = scalar_lea.sflag [#allocation5], %s2555_s25  ;;  %s2747_s29 = int_to_ptr.vmem [resolvable:$true] %s1933_s29 }
  0x33   : > { %v2333_v18 = vld [vmem:[%s2796_s0 + $0x48] sm:$0xff]   ;;  %v2334_v19 = vld [vmem:[%s2796_s0 + $0x50] sm:$0xff]   ;;  %v2335_v20 = vld [vmem:[%s2796_s0 + $0x58] sm:$0xff]   ;;  %s2368_s5 = scalar_lea.vmem %s2747_s29, 8192  ;;  %s2455_s6 = smov [#allocation6]  }
  0x34   : > { %710 = vmatpush1.bf16.msra.mxu0 %v2322_v7  ;;  %903 = vmatpush1.bf16.msra.mxu1 %v2323_v8  ;;  %v2336_v21 = vld [vmem:[%s2796_s0 + $0x60] sm:$0xff]   ;;  %v2337_v22 = vld [vmem:[%s2796_s0 + $0x68] sm:$0xff]   ;;  %v2338_v23 = vld [vmem:[%s2796_s0 + $0x70] sm:$0xff]   ;;  %p2369_p8 = scmp.ne.s32.totalorder %s2747_s29, %s2368_s5  ;;  %s2372_s7 = sshll.u32 %s2455_s6, 4  ;;  %s2373_s7 = int_to_ptr.vmem [resolvable:$false] %s2372_s7 }
  0x35   : > { %v2339_v24 = vld [vmem:[%s2796_s0 + $0x78] sm:$0xff]   ;;  %s2374_s8 = scalar_lea.vmem %s2373_s7, 16384  ;;  %p2375_p2 = scmp.lt.s32.totalorder %s2747_s29, %s2373_s7 }
  0x36   : > { %p2370_p13 = pnand %p2369_p8, %p2525_p9  ;;  %p2376_p3 = scmp.lt.s32.totalorder %s2374_s8, %s2368_s5 }
  0x37   : > { %2076 = vmatmul.mubr.msk.bf16.vlgmr.msra.gmra.mxu0 %vm646_vm0, %v2324_v9  ;;  %2092 = vmatmul.mubr.msk.bf16.vlgmr.msra.gmra.mxu1 %vm646_vm0, %v2324_v9 }
  0x38   : > { %737 = vmatprep.mubr.bf16.mxu0 %v2454_v0  ;;  %930 = vmatprep.mubr.bf16.mxu1 %v2454_v0  ;;  %p2371_p1 = pneg %p2370_p13  ;;  %p2377_p5 = por %p2376_p3, %p2375_p2 }
  0x3a   : > { %p2378_p6 = pnand %p2377_p5, %p2371_p1 }
  0x3f   : > { %2077 = vmatmul.mubr.msk.bf16.gmra.mxu0 %vm646_vm0, %v2325_v10  ;;  %2093 = vmatmul.mubr.msk.bf16.gmra.mxu1 %vm646_vm0, %v2325_v10 }
  0x40   : > { %747 = vmatprep.mubr.bf16.mxu0 %v2454_v0  ;;  %940 = vmatprep.mubr.bf16.mxu1 %v2454_v0 }
  0x47   : > { %2078 = vmatmul.mubr.msk.bf16.gmra.mxu0 %vm646_vm0, %v2326_v11  ;;  %2094 = vmatmul.mubr.msk.bf16.gmra.mxu1 %vm646_vm0, %v2326_v11 }
  0x48   : > { %757 = vmatprep.mubr.bf16.mxu0 %v2454_v0  ;;  %950 = vmatprep.mubr.bf16.mxu1 %v2454_v0 }
  0x4f   : > { %2079 = vmatmul.mubr.msk.bf16.gmra.mxu0 %vm646_vm0, %v2327_v12  ;;  %2095 = vmatmul.mubr.msk.bf16.gmra.mxu1 %vm646_vm0, %v2327_v12 }
  0x50   : > { %767 = vmatprep.mubr.bf16.mxu0 %v2454_v0  ;;  %960 = vmatprep.mubr.bf16.mxu1 %v2454_v0 }
  0x57   : > { %2080 = vmatmul.mubr.msk.bf16.gmra.mxu0 %vm646_vm0, %v2328_v13  ;;  %2096 = vmatmul.mubr.msk.bf16.gmra.mxu1 %vm646_vm0, %v2328_v13 }
  0x58   : > { %777 = vmatprep.mubr.bf16.mxu0 %v2454_v0  ;;  %970 = vmatprep.mubr.bf16.mxu1 %v2454_v0 }
  0x5f   : > { %2081 = vmatmul.mubr.msk.bf16.gmra.mxu0 %vm646_vm0, %v2329_v14  ;;  %2097 = vmatmul.mubr.msk.bf16.gmra.mxu1 %vm646_vm0, %v2329_v14 }
  0x60   : > { %787 = vmatprep.mubr.bf16.mxu0 %v2454_v0  ;;  %980 = vmatprep.mubr.bf16.mxu1 %v2454_v0 }
  0x67   : > { %2082 = vmatmul.mubr.msk.bf16.gmra.mxu0 %vm646_vm0, %v2330_v15  ;;  %2098 = vmatmul.mubr.msk.bf16.gmra.mxu1 %vm646_vm0, %v2330_v15 }
  0x68   : > { %797 = vmatprep.mubr.bf16.mxu0 %v2454_v0  ;;  %990 = vmatprep.mubr.bf16.mxu1 %v2454_v0 }
  0x6f   : > { %2083 = vmatmul.mubr.msk.bf16.gmra.mxu0 %vm646_vm0, %v2331_v16  ;;  %2099 = vmatmul.mubr.msk.bf16.gmra.mxu1 %vm646_vm0, %v2331_v16 }
  0x70   : > { %807 = vmatprep.mubr.bf16.mxu0 %v2454_v0  ;;  %1000 = vmatprep.mubr.bf16.mxu1 %v2454_v0 }
  0x77   : > { %2084 = vmatmul.mubr.msk.bf16.gmra.mxu0 %vm646_vm0, %v2332_v17  ;;  %2100 = vmatmul.mubr.msk.bf16.gmra.mxu1 %vm646_vm0, %v2332_v17 }
  0x78   : > { %817 = vmatprep.mubr.bf16.mxu0 %v2454_v0  ;;  %1010 = vmatprep.mubr.bf16.mxu1 %v2454_v0 }
  0x7f   : > { %2085 = vmatmul.mubr.msk.bf16.gmra.mxu0 %vm646_vm0, %v2333_v18  ;;  %2101 = vmatmul.mubr.msk.bf16.gmra.mxu1 %vm646_vm0, %v2333_v18 }
  0x80   : > { %827 = vmatprep.mubr.bf16.mxu0 %v2454_v0  ;;  %1020 = vmatprep.mubr.bf16.mxu1 %v2454_v0 }
  0x87   : > { %2086 = vmatmul.mubr.msk.bf16.gmra.mxu0 %vm646_vm0, %v2334_v19  ;;  %2102 = vmatmul.mubr.msk.bf16.gmra.mxu1 %vm646_vm0, %v2334_v19 }
  0x88   : > { %837 = vmatprep.mubr.bf16.mxu0 %v2454_v0  ;;  %1030 = vmatprep.mubr.bf16.mxu1 %v2454_v0 }
  0x8f   : > { %2087 = vmatmul.mubr.msk.bf16.gmra.mxu0 %vm646_vm0, %v2335_v20  ;;  %2103 = vmatmul.mubr.msk.bf16.gmra.mxu1 %vm646_vm0, %v2335_v20 }
  0x90   : > { %847 = vmatprep.mubr.bf16.mxu0 %v2454_v0  ;;  %1040 = vmatprep.mubr.bf16.mxu1 %v2454_v0 }
  0x97   : > { %2088 = vmatmul.mubr.msk.bf16.gmra.mxu0 %vm646_vm0, %v2336_v21  ;;  %2104 = vmatmul.mubr.msk.bf16.gmra.mxu1 %vm646_vm0, %v2336_v21 }
  0x98   : > { %857 = vmatprep.mubr.bf16.mxu0 %v2454_v0  ;;  %1050 = vmatprep.mubr.bf16.mxu1 %v2454_v0 }
  0x9f   : > { %2089 = vmatmul.mubr.msk.bf16.gmra.mxu0 %vm646_vm0, %v2337_v22  ;;  %2105 = vmatmul.mubr.msk.bf16.gmra.mxu1 %vm646_vm0, %v2337_v22 }
  0xa0   : > { %867 = vmatprep.mubr.bf16.mxu0 %v2454_v0  ;;  %1060 = vmatprep.mubr.bf16.mxu1 %v2454_v0 }
  0xa7   : > { %2090 = vmatmul.mubr.msk.bf16.gmra.mxu0 %vm646_vm0, %v2338_v23  ;;  %2106 = vmatmul.mubr.msk.bf16.gmra.mxu1 %vm646_vm0, %v2338_v23 }
  0xa8   : > { %877 = vmatprep.mubr.bf16.mxu0 %v2454_v0  ;;  %1070 = vmatprep.mubr.bf16.mxu1 %v2454_v0 }
  0xaf   : > { %2091 = vmatmul.mubr.msk.bf16.gmra.mxu0 %vm646_vm0, %v2339_v24  ;;  %2107 = vmatmul.mubr.msk.bf16.gmra.mxu1 %vm646_vm0, %v2339_v24 }
  0xf7   : > { %v729_v25 = vpop.f32.mrf.mxu0  ;;  %v922_v26 = vpop.f32.mrf.mxu1 }
  0xf9   : > { %v731_v27 = vpop.f32.mrf.mxu0  ;;  %v924_v28 = vpop.f32.mrf.mxu1 }
  0xfa   : > { %v2178_v29 = vpack.c.bf16 %v731_v27, %v729_v25  ;;  %v2179_v30 = vpack.c.bf16 %v924_v28, %v922_v26 }
  0xfb   : > { %v733_v31 = vpop.f32.mrf.mxu0  ;;  %v926_v32 = vpop.f32.mrf.mxu1 }
  0xfc   : > { %1852 = vst [vmem:[%s2676_s28] sm:$0xff] %v2178_v29  ;;  %1853 = vst [vmem:[%s2676_s28 + $0x8] sm:$0xff] %v2179_v30 }
  0xfd   : > { %v735_v33 = vpop.f32.mrf.mxu0  ;;  %v928_v34 = vpop.f32.mrf.mxu1 }
  0xfe   : > { %v2180_v35 = vpack.c.bf16 %v735_v33, %v733_v31  ;;  %v2181_v36 = vpack.c.bf16 %v928_v34, %v926_v32 }
  0xff   : > { %v739_v37 = vpop.f32.mrf.mxu0  ;;  %v932_v38 = vpop.f32.mrf.mxu1 }
 0x100   : > { %1854 = vst [vmem:[%s2676_s28 + $0x10] sm:$0xff] %v2180_v35  ;;  %1855 = vst [vmem:[%s2676_s28 + $0x18] sm:$0xff] %v2181_v36 }
 0x101   : > { %v741_v39 = vpop.f32.mrf.mxu0  ;;  %v934_v40 = vpop.f32.mrf.mxu1 }
 0x102   : > { %v2182_v41 = vpack.c.bf16 %v741_v39, %v739_v37  ;;  %v2183_v42 = vpack.c.bf16 %v934_v40, %v932_v38 }
 0x103   : > { %v743_v43 = vpop.f32.mrf.mxu0  ;;  %v936_v44 = vpop.f32.mrf.mxu1 }
 0x104   : > { %1856 = vst [vmem:[%s2676_s28 + $0x20] sm:$0xff] %v2182_v41  ;;  %1857 = vst [vmem:[%s2676_s28 + $0x28] sm:$0xff] %v2183_v42 }
 0x105   : > { %v745_v45 = vpop.f32.mrf.mxu0  ;;  %v938_v46 = vpop.f32.mrf.mxu1 }
 0x106   : > { %v2184_v47 = vpack.c.bf16 %v745_v45, %v743_v43  ;;  %v2185_v48 = vpack.c.bf16 %v938_v46, %v936_v44 }
 0x107   : > { %v749_v49 = vpop.f32.mrf.mxu0  ;;  %v942_v50 = vpop.f32.mrf.mxu1 }
 0x108   : > { %1858 = vst [vmem:[%s2676_s28 + $0x30] sm:$0xff] %v2184_v47  ;;  %1859 = vst [vmem:[%s2676_s28 + $0x38] sm:$0xff] %v2185_v48 }
 0x109   : > { %v751_v51 = vpop.f32.mrf.mxu0  ;;  %v944_v52 = vpop.f32.mrf.mxu1 }
 0x10a   : > { %v2186_v53 = vpack.c.bf16 %v751_v51, %v749_v49  ;;  %v2187_v54 = vpack.c.bf16 %v944_v52, %v942_v50 }
 0x10b   : > { %v753_v55 = vpop.f32.mrf.mxu0  ;;  %v946_v56 = vpop.f32.mrf.mxu1 }
 0x10c   : > { %1860 = vst [vmem:[%s2676_s28 + $0x40] sm:$0xff] %v2186_v53  ;;  %1861 = vst [vmem:[%s2676_s28 + $0x48] sm:$0xff] %v2187_v54 }
 0x10d   : > { %v755_v57 = vpop.f32.mrf.mxu0  ;;  %v948_v58 = vpop.f32.mrf.mxu1 }
 0x10e   : > { %v2188_v59 = vpack.c.bf16 %v755_v57, %v753_v55  ;;  %v2189_v60 = vpack.c.bf16 %v948_v58, %v946_v56 }
 0x10f   : > { %v759_v61 = vpop.f32.mrf.mxu0  ;;  %v952_v62 = vpop.f32.mrf.mxu1 }
 0x110   : > { %1862 = vst [vmem:[%s2676_s28 + $0x50] sm:$0xff] %v2188_v59  ;;  %1863 = vst [vmem:[%s2676_s28 + $0x58] sm:$0xff] %v2189_v60 }
 0x111   : > { %v761_v63 = vpop.f32.mrf.mxu0  ;;  %v954_v0 = vpop.f32.mrf.mxu1 }
 0x112   : > { %v2190_v1 = vpack.c.bf16 %v761_v63, %v759_v61  ;;  %v2191_v2 = vpack.c.bf16 %v954_v0, %v952_v62 }
 0x113   : > { %v763_v3 = vpop.f32.mrf.mxu0  ;;  %v956_v4 = vpop.f32.mrf.mxu1 }
 0x114   : > { %1864 = vst [vmem:[%s2676_s28 + $0x60] sm:$0xff] %v2190_v1  ;;  %1865 = vst [vmem:[%s2676_s28 + $0x68] sm:$0xff] %v2191_v2 }
 0x115   : > { %v765_v5 = vpop.f32.mrf.mxu0  ;;  %v958_v6 = vpop.f32.mrf.mxu1 }
 0x116   : > { %v2192_v7 = vpack.c.bf16 %v765_v5, %v763_v3  ;;  %v2193_v8 = vpack.c.bf16 %v958_v6, %v956_v4 }
 0x117   : > { %v769_v9 = vpop.f32.mrf.mxu0  ;;  %v962_v10 = vpop.f32.mrf.mxu1 }
 0x118   : > { %1866 = vst [vmem:[%s2676_s28 + $0x70] sm:$0xff] %v2192_v7  ;;  %1867 = vst [vmem:[%s2676_s28 + $0x78] sm:$0xff] %v2193_v8 }
 0x119   : > { %v771_v11 = vpop.f32.mrf.mxu0  ;;  %v964_v12 = vpop.f32.mrf.mxu1 }
 0x11a   : > { %v2194_v13 = vpack.c.bf16 %v771_v11, %v769_v9  ;;  %v2195_v14 = vpack.c.bf16 %v964_v12, %v962_v10 }
 0x11b   : > { %v773_v15 = vpop.f32.mrf.mxu0  ;;  %v966_v16 = vpop.f32.mrf.mxu1 }
 0x11c   : > { %1868 = vst [vmem:[%s2676_s28 + $0x80] sm:$0xff] %v2194_v13  ;;  %1869 = vst [vmem:[%s2676_s28 + $0x88] sm:$0xff] %v2195_v14 }
 0x11d   : > { %v775_v17 = vpop.f32.mrf.mxu0  ;;  %v968_v18 = vpop.f32.mrf.mxu1 }
 0x11e   : > { %v2196_v19 = vpack.c.bf16 %v775_v17, %v773_v15  ;;  %v2197_v20 = vpack.c.bf16 %v968_v18, %v966_v16 }
 0x11f   : > { %v779_v21 = vpop.f32.mrf.mxu0  ;;  %v972_v22 = vpop.f32.mrf.mxu1 }
 0x120   : > { %1870 = vst [vmem:[%s2676_s28 + $0x90] sm:$0xff] %v2196_v19  ;;  %1871 = vst [vmem:[%s2676_s28 + $0x98] sm:$0xff] %v2197_v20 }
 0x121   : > { %v781_v23 = vpop.f32.mrf.mxu0  ;;  %v974_v24 = vpop.f32.mrf.mxu1 }
 0x122   : > { %v2198_v25 = vpack.c.bf16 %v781_v23, %v779_v21  ;;  %v2199_v26 = vpack.c.bf16 %v974_v24, %v972_v22 }
 0x123   : > { %v783_v27 = vpop.f32.mrf.mxu0  ;;  %v976_v28 = vpop.f32.mrf.mxu1 }
 0x124   : > { %1872 = vst [vmem:[%s2676_s28 + $0xa0] sm:$0xff] %v2198_v25  ;;  %1873 = vst [vmem:[%s2676_s28 + $0xa8] sm:$0xff] %v2199_v26 }
 0x125   : > { %v785_v29 = vpop.f32.mrf.mxu0  ;;  %v978_v30 = vpop.f32.mrf.mxu1 }
 0x126   : > { %v2200_v31 = vpack.c.bf16 %v785_v29, %v783_v27  ;;  %v2201_v32 = vpack.c.bf16 %v978_v30, %v976_v28 }
 0x127   : > { %v789_v33 = vpop.f32.mrf.mxu0  ;;  %v982_v34 = vpop.f32.mrf.mxu1 }
 0x128   : > { %1874 = vst [vmem:[%s2676_s28 + $0xb0] sm:$0xff] %v2200_v31  ;;  %1875 = vst [vmem:[%s2676_s28 + $0xb8] sm:$0xff] %v2201_v32 }
 0x129   : > { %v791_v35 = vpop.f32.mrf.mxu0  ;;  %v984_v36 = vpop.f32.mrf.mxu1 }
 0x12a   : > { %v2202_v37 = vpack.c.bf16 %v791_v35, %v789_v33  ;;  %v2203_v38 = vpack.c.bf16 %v984_v36, %v982_v34 }
 0x12b   : > { %v793_v39 = vpop.f32.mrf.mxu0  ;;  %v986_v40 = vpop.f32.mrf.mxu1 }
 0x12c   : > { %1876 = vst [vmem:[%s2676_s28 + $0xc0] sm:$0xff] %v2202_v37  ;;  %1877 = vst [vmem:[%s2676_s28 + $0xc8] sm:$0xff] %v2203_v38 }
 0x12d   : > { %v795_v41 = vpop.f32.mrf.mxu0  ;;  %v988_v42 = vpop.f32.mrf.mxu1 }
 0x12e   : > { %v2204_v43 = vpack.c.bf16 %v795_v41, %v793_v39  ;;  %v2205_v44 = vpack.c.bf16 %v988_v42, %v986_v40 }
 0x12f   : > { %v799_v45 = vpop.f32.mrf.mxu0  ;;  %v992_v46 = vpop.f32.mrf.mxu1 }
 0x130   : > { %1878 = vst [vmem:[%s2676_s28 + $0xd0] sm:$0xff] %v2204_v43  ;;  %1879 = vst [vmem:[%s2676_s28 + $0xd8] sm:$0xff] %v2205_v44 }
 0x131   : > { %v801_v47 = vpop.f32.mrf.mxu0  ;;  %v994_v48 = vpop.f32.mrf.mxu1 }
 0x132   : > { %v2206_v49 = vpack.c.bf16 %v801_v47, %v799_v45  ;;  %v2207_v50 = vpack.c.bf16 %v994_v48, %v992_v46 }
 0x133   : > { %v803_v51 = vpop.f32.mrf.mxu0  ;;  %v996_v52 = vpop.f32.mrf.mxu1 }
 0x134   : > { %1880 = vst [vmem:[%s2676_s28 + $0xe0] sm:$0xff] %v2206_v49  ;;  %1881 = vst [vmem:[%s2676_s28 + $0xe8] sm:$0xff] %v2207_v50 }
 0x135   : > { %v805_v53 = vpop.f32.mrf.mxu0  ;;  %v998_v54 = vpop.f32.mrf.mxu1 }
 0x136   : > { %v2208_v55 = vpack.c.bf16 %v805_v53, %v803_v51  ;;  %v2209_v56 = vpack.c.bf16 %v998_v54, %v996_v52 }
 0x137   : > { %v809_v57 = vpop.f32.mrf.mxu0  ;;  %v1002_v58 = vpop.f32.mrf.mxu1 }
 0x138   : > { %1882 = vst [vmem:[%s2676_s28 + $0xf0] sm:$0xff] %v2208_v55  ;;  %1883 = vst [vmem:[%s2676_s28 + $0xf8] sm:$0xff] %v2209_v56 }
 0x139   : > { %v811_v59 = vpop.f32.mrf.mxu0  ;;  %v1004_v60 = vpop.f32.mrf.mxu1 }
 0x13a   : > { %v2210_v61 = vpack.c.bf16 %v811_v59, %v809_v57  ;;  %v2211_v62 = vpack.c.bf16 %v1004_v60, %v1002_v58 }
 0x13b   : > { %v813_v63 = vpop.f32.mrf.mxu0  ;;  %v1006_v0 = vpop.f32.mrf.mxu1 }
 0x13c   : > { %1884 = vst [vmem:[%s2676_s28 + $0x100] sm:$0xff] %v2210_v61  ;;  %1885 = vst [vmem:[%s2676_s28 + $0x108] sm:$0xff] %v2211_v62 }
 0x13d   : > { %v815_v1 = vpop.f32.mrf.mxu0  ;;  %v1008_v2 = vpop.f32.mrf.mxu1 }
 0x13e   : > { %v2212_v3 = vpack.c.bf16 %v815_v1, %v813_v63  ;;  %v2213_v4 = vpack.c.bf16 %v1008_v2, %v1006_v0 }
 0x13f   : > { %v819_v5 = vpop.f32.mrf.mxu0  ;;  %v1012_v6 = vpop.f32.mrf.mxu1 }
 0x140   : > { %1886 = vst [vmem:[%s2676_s28 + $0x110] sm:$0xff] %v2212_v3  ;;  %1887 = vst [vmem:[%s2676_s28 + $0x118] sm:$0xff] %v2213_v4 }
 0x141   : > { %v821_v7 = vpop.f32.mrf.mxu0  ;;  %v1014_v8 = vpop.f32.mrf.mxu1 }
 0x142   : > { %v2214_v9 = vpack.c.bf16 %v821_v7, %v819_v5  ;;  %v2215_v10 = vpack.c.bf16 %v1014_v8, %v1012_v6 }
 0x143   : > { %v823_v11 = vpop.f32.mrf.mxu0  ;;  %v1016_v12 = vpop.f32.mrf.mxu1 }
 0x144   : > { %1888 = vst [vmem:[%s2676_s28 + $0x120] sm:$0xff] %v2214_v9  ;;  %1889 = vst [vmem:[%s2676_s28 + $0x128] sm:$0xff] %v2215_v10 }
 0x145   : > { %v825_v13 = vpop.f32.mrf.mxu0  ;;  %v1018_v14 = vpop.f32.mrf.mxu1 }
 0x146   : > { %v2216_v15 = vpack.c.bf16 %v825_v13, %v823_v11  ;;  %v2217_v16 = vpack.c.bf16 %v1018_v14, %v1016_v12 }
 0x147   : > { %v829_v17 = vpop.f32.mrf.mxu0  ;;  %v1022_v18 = vpop.f32.mrf.mxu1 }
 0x148   : > { %1890 = vst [vmem:[%s2676_s28 + $0x130] sm:$0xff] %v2216_v15  ;;  %1891 = vst [vmem:[%s2676_s28 + $0x138] sm:$0xff] %v2217_v16 }
 0x149   : > { %v831_v19 = vpop.f32.mrf.mxu0  ;;  %v1024_v20 = vpop.f32.mrf.mxu1 }
 0x14a   : > { %v2218_v21 = vpack.c.bf16 %v831_v19, %v829_v17  ;;  %v2219_v22 = vpack.c.bf16 %v1024_v20, %v1022_v18 }
 0x14b   : > { %v833_v23 = vpop.f32.mrf.mxu0  ;;  %v1026_v24 = vpop.f32.mrf.mxu1 }
 0x14c   : > { %1892 = vst [vmem:[%s2676_s28 + $0x140] sm:$0xff] %v2218_v21  ;;  %1893 = vst [vmem:[%s2676_s28 + $0x148] sm:$0xff] %v2219_v22 }
 0x14d   : > { %v835_v25 = vpop.f32.mrf.mxu0  ;;  %v1028_v26 = vpop.f32.mrf.mxu1 }
 0x14e   : > { %v2220_v27 = vpack.c.bf16 %v835_v25, %v833_v23  ;;  %v2221_v28 = vpack.c.bf16 %v1028_v26, %v1026_v24 }
 0x14f   : > { %v839_v29 = vpop.f32.mrf.mxu0  ;;  %v1032_v30 = vpop.f32.mrf.mxu1 }
 0x150   : > { %1894 = vst [vmem:[%s2676_s28 + $0x150] sm:$0xff] %v2220_v27  ;;  %1895 = vst [vmem:[%s2676_s28 + $0x158] sm:$0xff] %v2221_v28 }
 0x151   : > { %v841_v31 = vpop.f32.mrf.mxu0  ;;  %v1034_v32 = vpop.f32.mrf.mxu1 }
 0x152   : > { %v2222_v33 = vpack.c.bf16 %v841_v31, %v839_v29  ;;  %v2223_v34 = vpack.c.bf16 %v1034_v32, %v1032_v30 }
 0x153   : > { %v843_v35 = vpop.f32.mrf.mxu0  ;;  %v1036_v36 = vpop.f32.mrf.mxu1 }
 0x154   : > { %1896 = vst [vmem:[%s2676_s28 + $0x160] sm:$0xff] %v2222_v33  ;;  %1897 = vst [vmem:[%s2676_s28 + $0x168] sm:$0xff] %v2223_v34 }
 0x155   : > { %v845_v37 = vpop.f32.mrf.mxu0  ;;  %v1038_v38 = vpop.f32.mrf.mxu1 }
 0x156   : > { %v2224_v39 = vpack.c.bf16 %v845_v37, %v843_v35  ;;  %v2225_v40 = vpack.c.bf16 %v1038_v38, %v1036_v36 }
 0x157   : > { %v849_v41 = vpop.f32.mrf.mxu0  ;;  %v1042_v42 = vpop.f32.mrf.mxu1 }
 0x158   : > { %1898 = vst [vmem:[%s2676_s28 + $0x170] sm:$0xff] %v2224_v39  ;;  %1899 = vst [vmem:[%s2676_s28 + $0x178] sm:$0xff] %v2225_v40 }
 0x159   : > { %v851_v43 = vpop.f32.mrf.mxu0  ;;  %v1044_v44 = vpop.f32.mrf.mxu1 }
 0x15a   : > { %v2226_v45 = vpack.c.bf16 %v851_v43, %v849_v41  ;;  %v2227_v46 = vpack.c.bf16 %v1044_v44, %v1042_v42 }
 0x15b   : > { %v853_v47 = vpop.f32.mrf.mxu0  ;;  %v1046_v48 = vpop.f32.mrf.mxu1 }
 0x15c   : > { %1900 = vst [vmem:[%s2676_s28 + $0x180] sm:$0xff] %v2226_v45  ;;  %1901 = vst [vmem:[%s2676_s28 + $0x188] sm:$0xff] %v2227_v46 }
 0x15d   : > { %v855_v49 = vpop.f32.mrf.mxu0  ;;  %v1048_v50 = vpop.f32.mrf.mxu1 }
 0x15e   : > { %v2228_v51 = vpack.c.bf16 %v855_v49, %v853_v47  ;;  %v2229_v52 = vpack.c.bf16 %v1048_v50, %v1046_v48 }
 0x15f   : > { %v859_v53 = vpop.f32.mrf.mxu0  ;;  %v1052_v54 = vpop.f32.mrf.mxu1 }
 0x160   : > { %1902 = vst [vmem:[%s2676_s28 + $0x190] sm:$0xff] %v2228_v51  ;;  %1903 = vst [vmem:[%s2676_s28 + $0x198] sm:$0xff] %v2229_v52 }
 0x161   : > { %v861_v55 = vpop.f32.mrf.mxu0  ;;  %v1054_v56 = vpop.f32.mrf.mxu1 }
 0x162   : > { %v2230_v57 = vpack.c.bf16 %v861_v55, %v859_v53  ;;  %v2231_v58 = vpack.c.bf16 %v1054_v56, %v1052_v54 }
 0x163   : > { %v863_v59 = vpop.f32.mrf.mxu0  ;;  %v1056_v60 = vpop.f32.mrf.mxu1 }
 0x164   : > { %1904 = vst [vmem:[%s2676_s28 + $0x1a0] sm:$0xff] %v2230_v57  ;;  %1905 = vst [vmem:[%s2676_s28 + $0x1a8] sm:$0xff] %v2231_v58 }
 0x165   : > { %v865_v61 = vpop.f32.mrf.mxu0  ;;  %v1058_v62 = vpop.f32.mrf.mxu1 }
 0x166   : > { %v2232_v63 = vpack.c.bf16 %v865_v61, %v863_v59  ;;  %v2233_v0 = vpack.c.bf16 %v1058_v62, %v1056_v60 }
 0x167   : > { %v869_v1 = vpop.f32.mrf.mxu0  ;;  %v1062_v2 = vpop.f32.mrf.mxu1 }
 0x168   : > { %1906 = vst [vmem:[%s2676_s28 + $0x1b0] sm:$0xff] %v2232_v63  ;;  %1907 = vst [vmem:[%s2676_s28 + $0x1b8] sm:$0xff] %v2233_v0 }
 0x169   : > { %v871_v3 = vpop.f32.mrf.mxu0  ;;  %v1064_v4 = vpop.f32.mrf.mxu1 }
 0x16a   : > { %v2234_v5 = vpack.c.bf16 %v871_v3, %v869_v1  ;;  %v2235_v6 = vpack.c.bf16 %v1064_v4, %v1062_v2 }
 0x16b   : > { %v873_v7 = vpop.f32.mrf.mxu0  ;;  %v1066_v8 = vpop.f32.mrf.mxu1 }
 0x16c   : > { %1908 = vst [vmem:[%s2676_s28 + $0x1c0] sm:$0xff] %v2234_v5  ;;  %1909 = vst [vmem:[%s2676_s28 + $0x1c8] sm:$0xff] %v2235_v6 }
 0x16d   : > { %v875_v9 = vpop.f32.mrf.mxu0  ;;  %v1068_v10 = vpop.f32.mrf.mxu1 }
 0x16e   : > { %v2236_v11 = vpack.c.bf16 %v875_v9, %v873_v7  ;;  %v2237_v12 = vpack.c.bf16 %v1068_v10, %v1066_v8 }
 0x16f   : > { %v879_v13 = vpop.f32.mrf.mxu0  ;;  %v1072_v14 = vpop.f32.mrf.mxu1 }
 0x170   : > { %1910 = vst [vmem:[%s2676_s28 + $0x1d0] sm:$0xff] %v2236_v11  ;;  %1911 = vst [vmem:[%s2676_s28 + $0x1d8] sm:$0xff] %v2237_v12 }
 0x171   : > { %v881_v15 = vpop.f32.mrf.mxu0  ;;  %v1074_v16 = vpop.f32.mrf.mxu1 }
 0x172   : > { %v2238_v17 = vpack.c.bf16 %v881_v15, %v879_v13  ;;  %v2239_v18 = vpack.c.bf16 %v1074_v16, %v1072_v14 }
 0x173   : > { %v883_v19 = vpop.f32.mrf.mxu0  ;;  %v1076_v20 = vpop.f32.mrf.mxu1 }
 0x174   : > { %1912 = vst [vmem:[%s2676_s28 + $0x1e0] sm:$0xff] %v2238_v17  ;;  %1913 = vst [vmem:[%s2676_s28 + $0x1e8] sm:$0xff] %v2239_v18 }
 0x175   : > { %v885_v21 = vpop.f32.mrf.mxu0  ;;  %v1078_v22 = vpop.f32.mrf.mxu1 }
 0x176   : > { %v2240_v23 = vpack.c.bf16 %v885_v21, %v883_v19  ;;  %v2241_v24 = vpack.c.bf16 %v1078_v22, %v1076_v20 }
 0x178   : > { %1914 = vst [vmem:[%s2676_s28 + $0x1f0] sm:$0xff] %v2240_v23  ;;  %1915 = vst [vmem:[%s2676_s28 + $0x1f8] sm:$0xff] %v2241_v24 }
 0x179   : > { %2381 = shalt.err (!%p2378_p6)
}
 0x17a   : > { %s2382_s15 = scalar_lea.hbm %s2745_s4, 8192  ;;  %s2386_s19 = scalar_lea.hbm %s2798_s2, 24576 }
 0x17b   : > { %p2383_p7 = scmp.ne.s32.totalorder %s2745_s4, %s2382_s15  ;;  %p2387_p12 = scmp.lt.s32.totalorder %s2745_s4, %s2798_s2 }
 0x17c   : > { %p2388_p0 = scmp.lt.s32.totalorder %s2386_s19, %s2382_s15 }
 0x17d   : > { %p2384_p10 = pnand %p2383_p7, %p2525_p9 }
 0x17e   : > { %p2389_p8 = por %p2388_p0, %p2387_p12 }
 0x17f   : > { %p2385_p4 = pneg %p2384_p10 }
 0x181   : > { %p2390_p13 = pnand %p2389_p8, %p2385_p4 }
 0x183   : > { %2393 = shalt.err (!%p2390_p13)
}
 0x184   : > { %s2456_s27 = smov 256   ;;  %s2457_s28 = smov 768  }
 0x185   : > { %s2458_s21 = smov 16  }
 0x186   : > { %2245 = dma.vmem_to_hbm [thread:$0]  (%p2525_p9), %s2747_s29, 8192, %s2745_s4, %s1917_s12, %s2456_s27, %s2457_s28, %s2458_s21  }
 0x187 PF: > { %p2256_p1 = scmp.ge.s32.totalorder %s2448_s14, 2  ;;  %s1948_s30 = sand.u32 1, %s2428_s9  }
 0x188   : > { %s1949_s3 = scalar_lea.sflag [#allocation5], %s1948_s30 }
 0x189   : > { %p2252_p2 = pnand %p2256_p1, %p2532_p11 }
 0x18b   : > { %p2253_p3 = pneg %p2252_p2 }
 0x18d   : > { %2423 = dma.done.wait (%p2253_p3), %s1949_s3, 8192  }
 0x18e   : > { %2425 = vsyncadd (%p2253_p3), %s1949_s3, 4294959104  ;;  %s18_s14 = sadd.s32 1, %s2448_s14   ;;  %s2804_s9 = smov %s2432_s10 }
 0x18f   : > { %p15_p5 = scmp.ge.s32.totalorder %s18_s14, 5   ;;  %s2805_s10 = smov %s2436_s11 }
 0x190   : > { %s2806_s11 = smov %s2530_s23  ;;  %s2807_s12 = smov %s2444_s13 }
 0x191   : > { %s2808_s13 = smov %s2810_s17  ;;  %17 = sbr.rel (!%p15_p5) target bundleno = 6 (0x6), region = 84 }
 0x196   :  { %1954 = vsyncpa [#allocation4], 1 }
 0x197   :  { %1956 = vsyncpa [#allocation4 + $0x1], 1 }
 0x198   :  { %1957 = vsyncpa [#allocation5], 1 }
 0x199   :  { %1959 = vsyncpa [#allocation5 + $0x1], 1 }

</bundles_post_ra>
